<compile_context>
chip_gen: v7x
topology: tpu7x:2x2x1
jax: 0.10.0
libtpu: 0.0.40
codegen_flags: <defaults>
</compile_context>

<pallas_src>
import functools

import jax
import jax.numpy as jnp
import numpy as np
from jax.experimental import pallas as pl
from jax.experimental.pallas import tpu as pltpu


# --------------------------------------------------------------------------------------
# Kernels
# --------------------------------------------------------------------------------------
def _stats_kernel(x_ref, o_ref, acc_ref, *, n_rows, tile_rows, blocks_per_core, need_mask):
    """Accumulate per-column sum (row 0) and sum-of-squares (row 1) into a (2, D) scratch.

    Grid is (core_split, row_blocks_per_core); each core owns one (1, 2, D) output block.
    """
    c = pl.program_id(0)
    i = pl.program_id(1)

    @pl.when(i == 0)
    def _():
        acc_ref[...] = jnp.zeros_like(acc_ref)

    x = x_ref[...].astype(jnp.float32)

    def _accumulate(v):
        acc_ref[0:1, :] += jnp.sum(v, axis=0, keepdims=True)
        acc_ref[1:2, :] += jnp.sum(v * v, axis=0, keepdims=True)

    if need_mask:
        # Only the block(s) whose logical rows spill past n_rows pay the mask cost; interior
        # tiles take the unmasked branch. (Fully out-of-range blocks of the 2-core split get
        # their block index clamped by Pallas and are zeroed here, contributing nothing.)
        start = (c * blocks_per_core + i) * tile_rows
        is_partial = start + tile_rows > n_rows

        @pl.when(jnp.logical_not(is_partial))
        def _():
            _accumulate(x)

        @pl.when(is_partial)
        def _():
            rows = jax.lax.broadcasted_iota(jnp.int32, x.shape, 0) + start
            _accumulate(jnp.where(rows < n_rows, x, 0.0))
    else:
        _accumulate(x)

    @pl.when(i == pl.num_programs(1) - 1)
    def _():
        o_ref[0] = acc_ref[...]


def _normalize_kernel(x_ref, scale_ref, shift_ref, o_ref):
    """y = x * scale + shift, lane-dense, single cast to the output dtype."""
    x = x_ref[...].astype(jnp.float32)
    o_ref[...] = (x * scale_ref[...] + shift_ref[...]).astype(o_ref.dtype)


# --------------------------------------------------------------------------------------
# Tiling / VMEM selection
# --------------------------------------------------------------------------------------
def _choose_tiling(N, D, x_itemsize, out_itemsize):
    """Pick (row_tile, vmem_limit_bytes) from D, dtypes and the per-core VMEM capacity."""
    try:
        vmem_cap = int(pltpu.get_tpu_info().vmem_capacity_bytes)
    except Exception:
        vmem_cap = 64 * 1024 * 1024  # conservative default: v7x per-TC VMEM
    # ~96-100 MiB on 128 MiB chips (v5e/v6e), ~48 MiB on 64 MiB chips (v7x).
    vmem_limit = int(min(0.75 * vmem_cap, 100 * 1024 * 1024))

    # Per-row VMEM footprint of the wider pass (pass 2): double-buffered input +
    # double-buffered output + ~2 f32 temporaries.
    per_row = D * (2 * x_itemsize + 2 * out_itemsize + 2 * 4)
    budget = max(int(0.6 * vmem_limit), per_row)

    if N <= 1024 and N * per_row <= budget:
        return N, vmem_limit  # single full-extent block (allowed even if N % 8 != 0)

    tn = budget // per_row
    tn = min(tn, 2048, N)
    if tn >= 32:
        tn -= tn % 32        # sublane-friendly for any dtype packing (f32/bf16/fp8)
    elif tn >= 8:
        tn -= tn % 8
    else:
        tn = min(8, N)
    return max(tn, 1), vmem_limit


# --------------------------------------------------------------------------------------
# Wrapper
# --------------------------------------------------------------------------------------
def time_first_batch_norm_1d(x, gamma, beta, *, groups=None, eps=1e-5):
    """Pallas implementation of TimeFirstBatchNorm1d.forward (training-mode batch stats)."""
    B, L, D = x.shape
    g = groups if groups else 1
    dim = D // g
    assert dim * g == D, "feature dim must be divisible by groups"

    N = B * L
    count = N * g  # rows in the (B*L*groups, dim) view PyTorch normalizes over
    x2d = x.reshape(N, D)  # lane-dense layout: last dim is the full feature width

    x_isz = jnp.dtype(x.dtype).itemsize
    tn, vmem_limit = _choose_tiling(N, D, x_isz, x_isz)

    nb = pl.cdiv(N, tn)                       # total row blocks
    split = 2 if nb >= 2 else 1               # per-TensorCore partial accumulators (v7x)
    blocks_per_core = pl.cdiv(nb, split)
    need_mask = (split * blocks_per_core * tn) != N

    # ---- Pass 1: per-D-column sum / sum-of-squares (per-core partials) ----
    stats_partial = pl.pallas_call(
        functools.partial(
            _stats_kernel,
            n_rows=N,
            tile_rows=tn,
            blocks_per_core=blocks_per_core,
            need_mask=need_mask,
        ),
        out_shape=jax.ShapeDtypeStruct((split, 2, D), jnp.float32),
        grid=(split, blocks_per_core),
        in_specs=[pl.BlockSpec((tn, D), lambda c, i: (c * blocks_per_core + i, 0))],
        out_specs=pl.BlockSpec((1, 2, D), lambda c, i: (c, 0, 0)),
        scratch_shapes=[pltpu.VMEM((2, D), jnp.float32)],
        compiler_params=pltpu.CompilerParams(
            dimension_semantics=("parallel", "arbitrary"),
            vmem_limit_bytes=vmem_limit,
        ),
        cost_estimate=pl.CostEstimate(
            flops=3 * N * D,
            transcendentals=0,
            bytes_accessed=N * D * x_isz + split * 2 * D * 4,
        ),
    )(x2d)

    # ---- Tiny JAX glue: fold core partials + group axis, build per-column scale/shift ----
    stats = stats_partial.sum(axis=0)                 # (2, D)
    sums = stats[0].reshape(g, dim).sum(axis=0)       # (dim,)
    sumsqs = stats[1].reshape(g, dim).sum(axis=0)     # (dim,)
    mean = sums / count
    var = jnp.maximum(sumsqs / count - mean * mean, 0.0)  # biased var; clamp cancellation
    inv_std = jax.lax.rsqrt(var + eps)
    scale = gamma.astype(jnp.float32) * inv_std            # (dim,)
    shift = beta.astype(jnp.float32) - mean * scale        # (dim,)
    scale_d = jnp.tile(scale, (g,)).reshape(1, D)           # re-tile to lane-dense (1, D)
    shift_d = jnp.tile(shift, (g,)).reshape(1, D)

    # ---- Pass 2: normalize, 2 VALU ops per element, lane-dense stores, megacore-parallel ----
    out2d = pl.pallas_call(
        _normalize_kernel,
        out_shape=jax.ShapeDtypeStruct((N, D), x.dtype),
        grid=(nb,),
        in_specs=[
            pl.BlockSpec((tn, D), lambda i: (i, 0)),
            pl.BlockSpec((1, D), lambda i: (0, 0)),
            pl.BlockSpec((1, D), lambda i: (0, 0)),
        ],
        out_specs=pl.BlockSpec((tn, D), lambda i: (i, 0)),
        compiler_params=pltpu.CompilerParams(
            dimension_semantics=("parallel",),
            vmem_limit_bytes=vmem_limit,
        ),
        cost_estimate=pl.CostEstimate(
            flops=2 * N * D,
            transcendentals=0,
            bytes_accessed=2 * N * D * x_isz + 2 * D * 4,
        ),
    )(x2d, scale_d, shift_d)

    # (N, D) row-major is elementwise identical to the (N*g, dim) PyTorch view, so these
    # reshapes reproduce tensor.view(-1, length, groups, dim) / view(-1, length, dim) exactly.
    if groups:
        return out2d.reshape(B, L, groups, dim)
    return out2d.reshape(B, L, dim)


# --------------------------------------------------------------------------------------
# Pure-JAX reference + self-test
# --------------------------------------------------------------------------------------
def _reference(x, gamma, beta, *, groups=None, eps=1e-5):
    B, L, D = x.shape
    dim = D // groups if groups else D
    flat = x.reshape(-1, dim).astype(jnp.float32)
    mean = jnp.mean(flat, axis=0, keepdims=True)
    var = jnp.mean((flat - mean) ** 2, axis=0, keepdims=True)
    y = (flat - mean) / jnp.sqrt(var + eps) * gamma.reshape(1, dim) + beta.reshape(1, dim)
    y = y.astype(x.dtype)
    if groups:
        return y.reshape(-1, L, groups, dim)
    return y.reshape(-1, L, dim)


if __name__ == "__main__":
    key = jax.random.PRNGKey(0)
    k_x, k_g, k_b, k_g2, k_b2 = jax.random.split(key, 5)

    # Module config: TimeFirstBatchNorm1d(dim=32, groups=4) applied to (B=2, L=8, D=128)
    B, L, groups, per_group_dim = 2, 8, 4, 32
    D = groups * per_group_dim
    eps = 1e-5

    x = jax.random.normal(k_x, (B, L, D), dtype=jnp.float32)
    gamma = 1.0 + 0.1 * jax.random.normal(k_g, (per_group_dim,), dtype=jnp.float32)
    beta = 0.1 * jax.random.normal(k_b, (per_group_dim,), dtype=jnp.float32)

    out = time_first_batch_norm_1d(x, gamma, beta, groups=groups, eps=eps)
    out = jax.block_until_ready(out)
    ref = _reference(x, gamma, beta, groups=groups, eps=eps)
    np.testing.assert_allclose(np.asarray(out), np.asarray(ref), rtol=1e-4, atol=1e-4)
    assert out.shape == (B, L, groups, per_group_dim)

    # Also exercise the groups=None path (TimeFirstBatchNorm1d(dim=128)).
    gamma_f = 1.0 + 0.1 * jax.random.normal(k_g2, (D,), dtype=jnp.float32)
    beta_f = 0.1 * jax.random.normal(k_b2, (D,), dtype=jnp.float32)
    out_f = time_first_batch_norm_1d(x, gamma_f, beta_f, groups=None, eps=eps)
    out_f = jax.block_until_ready(out_f)
    ref_f = _reference(x, gamma_f, beta_f, groups=None, eps=eps)
    np.testing.assert_allclose(np.asarray(out_f), np.asarray(ref_f), rtol=1e-4, atol=1e-4)
    assert out_f.shape == (B, L, D)

    print("KERNEL_OK")
</pallas_src>

<mosaic_0001>
module attributes {stable_mosaic.version = 11 : i64} {
  func.func @_stats_kernel(%arg0: i32, %arg1: i32, %arg2: memref<16x128xf32, #tpu.memory_space<vmem>>, %arg3: memref<1x2x128xf32, #tpu.memory_space<vmem>>, %arg4: memref<2x128xf32, #tpu.memory_space<vmem>>) attributes {dimension_semantics = [#tpu.dimension_semantics<parallel>, #tpu.dimension_semantics<arbitrary>], iteration_bounds = array<i64: 1, 1>, scalar_prefetch = 0 : i64, scratch_operands = 1 : i64, tpu.core_type = #tpu.core_type<tc>, window_params = [{transform_indices = @transform_0, window_bounds = array<i64: 16, 128>}, {transform_indices = @transform_1, window_bounds = array<i64: 1, 2, 128>}]} {
    %c0_i32 = arith.constant 0 : i32
    %0 = arith.cmpi eq, %arg1, %c0_i32 : i32
    %1 = arith.extui %0 : i1 to i32
    %c0_i32_0 = arith.constant 0 : i32
    %2 = arith.cmpi ne, %1, %c0_i32_0 : i32
    scf.if %2 {
      %cst_12 = arith.constant 0.000000e+00 : f32
      %18 = vector.broadcast %cst_12 : f32 to vector<2x128xf32>
      %c0_13 = arith.constant 0 : index
      %c0_14 = arith.constant 0 : index
      %19 = vector.load %arg4[%c0_13, %c0_14] : memref<2x128xf32, #tpu.memory_space<vmem>>, vector<2x128xf32>
      tpu.vector_store %arg4[%c0_13, %c0_14], %18 {strides = array<i32>} : memref<2x128xf32, #tpu.memory_space<vmem>>, vector<2x128xf32>,
    } else {
    }
    %c0 = arith.constant 0 : index
    %c0_1 = arith.constant 0 : index
    %3 = vector.load %arg2[%c0, %c0_1] : memref<16x128xf32, #tpu.memory_space<vmem>>, vector<16x128xf32>
    %c0_2 = arith.constant 0 : index
    %c0_3 = arith.constant 0 : index
    %4 = vector.load %arg4[%c0_2, %c0_3] : memref<2x128xf32, #tpu.memory_space<vmem>>, vector<1x128xf32>
    %cst = arith.constant dense<0.000000e+00> : vector<128xf32>
    %5 = vector.multi_reduction <add>, %3, %cst [0] : vector<16x128xf32> to vector<128xf32>
    %6 = vector.shape_cast %5 : vector<128xf32> to vector<1x128xf32>
    %7 = arith.addf %4, %6 : vector<1x128xf32>
    %c0_4 = arith.constant 0 : index
    %c0_5 = arith.constant 0 : index
    %8 = vector.load %arg4[%c0_4, %c0_5] : memref<2x128xf32, #tpu.memory_space<vmem>>, vector<1x128xf32>
    tpu.vector_store %arg4[%c0_4, %c0_5], %7 {strides = array<i32>} : memref<2x128xf32, #tpu.memory_space<vmem>>, vector<1x128xf32>,
    %c1 = arith.constant 1 : index
    %c0_6 = arith.constant 0 : index
    %9 = vector.load %arg4[%c1, %c0_6] : memref<2x128xf32, #tpu.memory_space<vmem>>, vector<1x128xf32>
    %10 = arith.mulf %3, %3 : vector<16x128xf32>
    %cst_7 = arith.constant dense<0.000000e+00> : vector<128xf32>
    %11 = vector.multi_reduction <add>, %10, %cst_7 [0] : vector<16x128xf32> to vector<128xf32>
    %12 = vector.shape_cast %11 : vector<128xf32> to vector<1x128xf32>
    %13 = arith.addf %9, %12 : vector<1x128xf32>
    %c1_8 = arith.constant 1 : index
    %c0_9 = arith.constant 0 : index
    %14 = vector.load %arg4[%c1_8, %c0_9] : memref<2x128xf32, #tpu.memory_space<vmem>>, vector<1x128xf32>
    tpu.vector_store %arg4[%c1_8, %c0_9], %13 {strides = array<i32>} : memref<2x128xf32, #tpu.memory_space<vmem>>, vector<1x128xf32>,
    %c0_i32_10 = arith.constant 0 : i32
    %15 = arith.cmpi eq, %arg1, %c0_i32_10 : i32
    %16 = arith.extui %15 : i1 to i32
    %c0_i32_11 = arith.constant 0 : i32
    %17 = arith.cmpi ne, %16, %c0_i32_11 : i32
    scf.if %17 {
      %c0_12 = arith.constant 0 : index
      %c0_13 = arith.constant 0 : index
      %18 = vector.load %arg4[%c0_12, %c0_13] : memref<2x128xf32, #tpu.memory_space<vmem>>, vector<2x128xf32>
      %c0_14 = arith.constant 0 : index
      %c0_15 = arith.constant 0 : index
      %c0_16 = arith.constant 0 : index
      %19 = vector.load %arg3[%c0_14, %c0_15, %c0_16] : memref<1x2x128xf32, #tpu.memory_space<vmem>>, vector<1x2x128xf32>
      %20 = vector.shape_cast %19 : vector<1x2x128xf32> to vector<2x128xf32>
      %21 = vector.shape_cast %18 : vector<2x128xf32> to vector<1x2x128xf32>
      tpu.vector_store %arg3[%c0_14, %c0_15, %c0_16], %21 {strides = array<i32>} : memref<1x2x128xf32, #tpu.memory_space<vmem>>, vector<1x2x128xf32>,
    } else {
    }
    return
  }
  func.func @transform_0(%arg0: i32, %arg1: i32) -> (i32, i32) {
    %c1_i32 = arith.constant 1 : i32
    %0 = arith.muli %arg0, %c1_i32 : i32
    %1 = arith.addi %0, %arg1 : i32
    %c0_i32 = arith.constant 0 : i32
    %c0_i32_0 = arith.constant 0 : i32
    return %1, %c0_i32 : i32, i32
  }
  func.func @transform_1(%arg0: i32, %arg1: i32) -> (i32, i32, i32) {
    %c0_i32 = arith.constant 0 : i32
    %c0_i32_0 = arith.constant 0 : i32
    %c0_i32_1 = arith.constant 0 : i32
    return %arg0, %c0_i32, %c0_i32_0 : i32, i32, i32
  }
}

</mosaic_0001>

<bundles_post_ra>
// kernel: tpu_custom_call.1
= control target key start
LH: loop header
LB: loop body
LE: loop exit
PB: predicated region body
PF: predicated region fallthrough
CT: control target
= control target key end

     0   :  { %6 = vsyncpa [#allocation4], 0  ;;  %s170_s0 = inlined_call_operand.hbm [shape: f32[16,128], index: 0, kind: input, shape index: {}]   ;;  %s171_s1 = inlined_call_operand.hbm [shape: f32[1,2,128], index: 1, kind: output, shape index: {}]  }
   0x1   :  { %7 = vsyncpa [#allocation5], 0  ;;  %s131_s6 = smov [#allocation3]   ;;  %s83_s10 = scalar_lea.hbm %s170_s0, 256 }
   0x2   :  { %s17_s7 = sshll.u32 %s131_s6, 4  ;;  %p84_p0 = scmp.ne.s32.totalorder %s170_s0, %s83_s10  ;;  %s18_s7 = int_to_ptr.vmem [resolvable:$true] %s17_s7 }
   0x3   :  { %p87_p1 = scmp.lt.u32.totalorder %s83_s10, %s170_s0 }
   0x5   :  { %p89_p2 = pnand %p87_p1, %p84_p0 }
   0x7   :  { %92 = shalt.err (!%p89_p2)
}
   0x8   :  { %s93_s15 = scalar_lea.vmem %s18_s7, 256  ;;  %p98_p4 = scmp.lt.s32.totalorder %s18_s7, %s18_s7 }
   0x9   :  { %p94_p3 = scmp.ne.s32.totalorder %s18_s7, %s93_s15  ;;  %p99_p5 = scmp.lt.s32.totalorder %s93_s15, %s93_s15 }
   0xb   :  { %p100_p6 = por %p99_p5, %p98_p4 }
   0xd   :  { %p101_p7 = pnand %p100_p6, %p94_p3 }
   0xf   :  { %104 = shalt.err (!%p101_p7)
}
  0x10   :  { %s132_s16 = smov 128   ;;  %s133_s17 = smov 8  }
  0x11   :  { %23 = dma.hbm_to_vmem [thread:$0]  %s170_s0, 256, %s18_s7, [#allocation4], %s132_s16, %s132_s16, %s133_s17  }
  0x12   :  { %127 = dma.done.wait [#allocation4], 256  }
  0x13   :  { %128 = vsyncadd [#allocation4], 4294967040  ;;  %v134_v0 = vmov 0.0   ;;  %v34_v1 = vld [vmem:[#allocation3] sm:$0xff]  ;;  %v35_v2 = vld [vmem:[#allocation3 + $0x8] sm:$0xff]  ;;  %s135_s0 = smov [#allocation6]  }
  0x14   :  { %33 = vst [vmem:[#allocation2] sm:$0x3] %v134_v0  ;;  %v37_v3 = vadd.f32 %v35_v2, %v34_v1  ;;  %v47_v4 = vmul.f32 %v34_v1, %v34_v1  ;;  %v48_v5 = vmul.f32 %v35_v2, %v35_v2  ;;  %s69_s20 = sshll.u32 %s135_s0, 4  ;;  %s70_s20 = int_to_ptr.vmem [resolvable:$true] %s69_s20 }
  0x15   :  { %s105_s21 = scalar_lea.vmem %s70_s20, 32  ;;  %p110_p9 = scmp.lt.s32.totalorder %s70_s20, %s70_s20 }
  0x16   :  { %v38_v6 = vrot.slane %v37_v3, 4  ;;  %v49_v7 = vadd.f32 %v48_v5, %v47_v4  ;;  %p106_p8 = scmp.ne.s32.totalorder %s70_s20, %s105_s21  ;;  %p111_p10 = scmp.lt.s32.totalorder %s105_s21, %s105_s21 }
  0x18   :  { %v39_v8 = vadd.f32 %v38_v6, %v37_v3  ;;  %v50_v9 = vrot.slane %v49_v7, 4  ;;  %p112_p11 = por %p111_p10, %p110_p9 }
  0x1a   :  { %v40_v10 = vrot.slane %v39_v8, 2  ;;  %v51_v11 = vadd.f32 %v50_v9, %v49_v7  ;;  %p113_p12 = pnand %p112_p11, %p106_p8 }
  0x1b   :  { %v36_v16 = vld [vmem:[#allocation2] sm:$0x1]  ;;  %v46_v19 = vld [vmem:[#allocation2 + $0x1] sm:$0x1] }
  0x1c   :  { %v41_v12 = vadd.f32 %v40_v10, %v39_v8  ;;  %v52_v13 = vrot.slane %v51_v11, 2 }
  0x1e   :  { %v42_v14 = vrot.slane %v41_v12, 1  ;;  %v53_v15 = vadd.f32 %v52_v13, %v51_v11 }
  0x20   :  { %v43_v17 = vadd.f32 %v42_v14, %v41_v12  ;;  %v54_v18 = vrot.slane %v53_v15, 1 }
  0x22   :  { %v44_v20 = vadd.f32 %v43_v17, %v36_v16  ;;  %v55_v21 = vadd.f32 %v54_v18, %v53_v15 }
  0x24   :  { %45 = vst [vmem:[#allocation2] sm:$0x1] %v44_v20  ;;  %v56_v22 = vadd.f32 %v55_v21, %v46_v19 }
  0x26   :  { %57 = vst [vmem:[#allocation2 + $0x1] sm:$0x1] %v56_v22 }
  0x2d   :  { %v61_v23 = vld [vmem:[#allocation2] sm:$0x3] }
  0x2e   :  { %62 = vst [vmem:[#allocation6] sm:$0x3] %v61_v23 }
  0x2f   :  { %116 = shalt.err (!%p113_p12)
}
  0x30   :  { %s117_s24 = scalar_lea.hbm %s171_s1, 32 }
  0x31   :  { %p118_p13 = scmp.ne.s32.totalorder %s171_s1, %s117_s24  ;;  %p121_p0 = scmp.lt.u32.totalorder %s117_s24, %s171_s1 }
  0x33   :  { %p123_p1 = pnand %p121_p0, %p118_p13 }
  0x35   :  { %126 = shalt.err (!%p123_p1)
}
  0x36   :  { %72 = dma.vmem_to_hbm [thread:$0]  %s70_s20, 32, %s171_s1, [#allocation5]  }
  0x37   :  { %129 = dma.done.wait [#allocation5], 32  }
  0x38   :  { %130 = vsyncadd [#allocation5], 4294967264 }
  0x39   :  { %76 = vsyncpa [#allocation4], 1 }
  0x3a   :  { %77 = vsyncpa [#allocation5], 1 }

</bundles_post_ra>
